<compile_context>
chip_gen: v5e
topology: v5e:2x2
jax: 0.10.0
libtpu: 0.0.40
codegen_flags: <defaults>
</compile_context>

<pallas_src>
import math

import jax
import jax.numpy as jnp
from jax.experimental import pallas as pl
from jax.experimental.pallas import tpu as pltpu

EPSILON = 1e-8


# --------------------------------------------------------------------------------------
# Pallas kernel: radial MLP + distance mask + unit vectors + eye(3) contraction
# --------------------------------------------------------------------------------------
def filter1_kernel(rbf_ref, rijt_ref, lit_ref, w1_ref, b1_ref, w2_ref, b2_ref, out_ref):
    # rbf_ref : [tm*N, D_in]   (rows = all (a,b) pairs of this row tile)
    # rijt_ref: [3, tm, N]
    # lit_ref : [3, N, F_pad]
    # w1_ref  : [D_in, H_pad]  b1_ref: [1, H_pad]
    # w2_ref  : [H_pad, F_pad] b2_ref: [1, F_pad]
    # out_ref : [tm, F_pad]
    tm = rijt_ref.shape[1]
    n = rijt_ref.shape[2]
    f_pad = w2_ref.shape[1]

    # ---- Radial MLP on the MXU: relu(x @ W1 + b1) @ W2 + b2, lane-dense H_pad/F_pad ----
    hidden = jnp.dot(rbf_ref[...], w1_ref[...], preferred_element_type=jnp.float32)
    hidden = jnp.maximum(hidden + b1_ref[...], 0.0)
    radial = jnp.dot(hidden, w2_ref[...], preferred_element_type=jnp.float32) + b2_ref[...]
    # Split leading dim only (lane dim stays F_pad=128k): sublane relabel, free for N % 8 == 0.
    radial = radial.reshape(tm, n, f_pad)                       # [tm, N, F_pad]

    # ---- distances, masked inverse, unit vectors (tiny [tm, N] ops) ----
    rx = rijt_ref[0]                                            # [tm, N]
    ry = rijt_ref[1]
    rz = rijt_ref[2]
    dij = jnp.sqrt(rx * rx + ry * ry + rz * rz)                 # [tm, N]
    # Exact reciprocal (approx=True would be ~2^-12 relative error, outside 1e-5 tolerance);
    # this is a [tm, N] op, negligible next to the [tm, N, 128] work below.
    inv = pl.reciprocal(dij + EPSILON, approx=False)
    # Fold the (dij < EPSILON) radial mask into inv: zeroing u zeroes the whole contribution,
    # exactly matching where(cond, 0, radial) without touching a [tm, N, F] tensor.
    inv = jnp.where(dij < EPSILON, 0.0, inv)
    ux = rx * inv
    uy = ry * inv
    uz = rz * inv                                               # [tm, N]

    # ---- eye(3) contraction: result[a,f] = sum_b radial[a,b,f] * (u[a,b,:] . li[b,f,:]) ----
    lx = lit_ref[0]                                             # [N, F_pad]
    ly = lit_ref[1]
    lz = lit_ref[2]
    dotp = (ux[..., None] * lx[None, :, :]
            + uy[..., None] * ly[None, :, :]
            + uz[..., None] * lz[None, :, :])                   # [tm, N, F_pad]
    out_ref[...] = jnp.sum(radial * dotp, axis=1)               # [tm, F_pad]  (lane-dense store)


# --------------------------------------------------------------------------------------
# Wrapper: padding / layout plumbing + pallas_call with a row-tiled grid
# --------------------------------------------------------------------------------------
def _round_up(x, m):
    return ((x + m - 1) // m) * m


def _default_row_tile(n):
    if n <= 128:
        return n
    # Keep the [tm*N, 128] f32 intermediates (hidden / radial / dotp) around <=32 MiB each;
    # prefer tiles that are multiples of 8 sublanes.
    for tm in (128, 64, 32, 16, 8):
        if n % tm == 0:
            return tm
    return n


def filter_1_output_0(layer_input, rbf_inputs, rij, params, *, row_tile=None):
    """layer_input: [N, F, 3], rbf_inputs: [N, N, D_in], rij: [N, N, 3] -> [N, F, 1].

    Weights are stored pre-transposed: W1 [D_in, H], W2 [H, F]
    (torch keeps [H, D_in] / [F, H] and contracts with dims=([-1],[1])).
    """
    w1, b1, w2, b2 = params
    n = rbf_inputs.shape[0]
    d_in = rbf_inputs.shape[-1]
    h = w1.shape[-1]
    f = w2.shape[-1]

    f_pad = _round_up(max(f, 1), 128)
    h_pad = _round_up(max(h, 1), 128)
    tm = row_tile if row_tile is not None else _default_row_tile(n)
    assert n % tm == 0, (n, tm)

    f32 = jnp.float32
    rbf2d = rbf_inputs.reshape(n * n, d_in).astype(f32)                      # [N*N, D_in]
    rijt = jnp.transpose(rij.astype(f32), (2, 0, 1))                         # [3, N, N]
    li = layer_input.reshape(-1, layer_input.shape[-2], layer_input.shape[-1]).astype(f32)
    lit = jnp.pad(jnp.transpose(li, (2, 0, 1)), ((0, 0), (0, 0), (0, f_pad - f)))  # [3, N, F_pad]

    # Zero-padded parameters (numerically exact: padded columns/rows contribute 0).
    w1p = jnp.pad(w1.astype(f32), ((0, 0), (0, h_pad - h)))                  # [D_in, H_pad]
    b1p = jnp.pad(b1.astype(f32), (0, h_pad - h)).reshape(1, h_pad)          # [1, H_pad]
    w2p = jnp.pad(w2.astype(f32), ((0, h_pad - h), (0, f_pad - f)))          # [H_pad, F_pad]
    b2p = jnp.pad(b2.astype(f32), (0, f_pad - f)).reshape(1, f_pad)          # [1, F_pad]

    out = pl.pallas_call(
        filter1_kernel,
        out_shape=jax.ShapeDtypeStruct((n, f_pad), f32),
        grid_spec=pltpu.PrefetchScalarGridSpec(
            num_scalar_prefetch=0,
            grid=(n // tm,),
            in_specs=[
                pl.BlockSpec((tm * n, d_in), lambda i: (i, 0)),      # rbf rows of this tile
                pl.BlockSpec((3, tm, n), lambda i: (0, i, 0)),       # rij components of this tile
                pl.BlockSpec((3, n, f_pad), lambda i: (0, 0, 0)),    # layer_input: resident
                pl.BlockSpec((d_in, h_pad), lambda i: (0, 0)),       # W1: resident
                pl.BlockSpec((1, h_pad), lambda i: (0, 0)),          # b1: resident
                pl.BlockSpec((h_pad, f_pad), lambda i: (0, 0)),      # W2: resident
                pl.BlockSpec((1, f_pad), lambda i: (0, 0)),          # b2: resident
            ],
            out_specs=pl.BlockSpec((tm, f_pad), lambda i: (i, 0)),
        ),
        compiler_params=pltpu.CompilerParams(
            dimension_semantics=("parallel",),          # row tiles are independent (megacore on v7x)
            vmem_limit_bytes=48 * 1024 * 1024,          # explicit budget, safe on v5e/v6e/v7x
        ),
    )(rbf2d, rijt, lit, w1p, b1p, w2p, b2p)

    # Layout plumbing back to the module's output shape [N, F, 1].
    return out[:, :f, None]


# --------------------------------------------------------------------------------------
# Pure-JAX reference (mirrors the PyTorch forward exactly)
# --------------------------------------------------------------------------------------
def reference(layer_input, rbf_inputs, rij, params):
    w1, b1, w2, b2 = params
    hidden = jax.nn.relu(b1 + jnp.tensordot(rbf_inputs, w1, axes=([-1], [0])))
    radial = b2 + jnp.tensordot(hidden, w2, axes=([-1], [0]))                # [N, N, F]
    dij = jnp.linalg.norm(rij, axis=-1)
    masked_radial = jnp.where((dij < EPSILON)[..., None], 0.0, radial)
    unit = rij / (jnp.linalg.norm(rij, axis=-1, keepdims=True) + EPSILON)
    f1 = unit[:, :, None, :] * masked_radial[..., None]                      # [N, N, F, 3]
    cg = jnp.eye(3, dtype=jnp.float32)[None]                                 # [1, 3, 3]
    li = layer_input.reshape(-1, layer_input.shape[-2], layer_input.shape[-1])
    return jnp.einsum('ijk,abfj,bfk->afi', cg, f1, li)                       # [N, F, 1]


# --------------------------------------------------------------------------------------
if __name__ == "__main__":
    N, D_IN, HIDDEN, F_OUT = 8, 32, 32, 4   # hidden_dim defaults to input_dim in the module

    key = jax.random.PRNGKey(0)
    k_coords, k_rbf, k_li, k_w1, k_w2 = jax.random.split(key, 5)

    # Pairwise relative vectors (diagonal is exactly zero -> exercises the dij < EPS mask)
    coords = jax.random.normal(k_coords, (N, 3), dtype=jnp.float32)
    rij = coords[:, None, :] - coords[None, :, :]                            # [N, N, 3]
    rbf_inputs = jax.random.normal(k_rbf, (N, N, D_IN), dtype=jnp.float32)
    layer_input = jax.random.normal(k_li, (N, F_OUT, 3), dtype=jnp.float32)

    # Deterministic Xavier-uniform parameters (stored pre-transposed for the kernel)
    bound1 = math.sqrt(6.0 / (D_IN + HIDDEN))
    bound2 = math.sqrt(6.0 / (HIDDEN + F_OUT))
    w1 = jax.random.uniform(k_w1, (D_IN, HIDDEN), jnp.float32, -bound1, bound1)
    b1 = jnp.zeros((HIDDEN,), jnp.float32)
    w2 = jax.random.uniform(k_w2, (HIDDEN, F_OUT), jnp.float32, -bound2, bound2)
    b2 = jnp.zeros((F_OUT,), jnp.float32)
    params = (w1, b1, w2, b2)

    out = filter_1_output_0(layer_input, rbf_inputs, rij, params)
    out = jax.block_until_ready(out)

    ref = reference(layer_input, rbf_inputs, rij, params)
    assert out.shape == (N, F_OUT, 1), out.shape
    assert jnp.allclose(out, ref, rtol=1e-5, atol=1e-5), float(jnp.max(jnp.abs(out - ref)))

    print("KERNEL_OK")
</pallas_src>

<mosaic_0001>
module attributes {stable_mosaic.version = 11 : i64} {
  func.func @filter1_kernel(%arg0: i32, %arg1: memref<64x32xf32, #tpu.memory_space<vmem>>, %arg2: memref<3x8x8xf32, #tpu.memory_space<vmem>>, %arg3: memref<3x8x128xf32, #tpu.memory_space<vmem>>, %arg4: memref<32x128xf32, #tpu.memory_space<vmem>>, %arg5: memref<1x128xf32, #tpu.memory_space<vmem>>, %arg6: memref<128x128xf32, #tpu.memory_space<vmem>>, %arg7: memref<1x128xf32, #tpu.memory_space<vmem>>, %arg8: memref<8x128xf32, #tpu.memory_space<vmem>>) attributes {dimension_semantics = [#tpu.dimension_semantics<parallel>], iteration_bounds = array<i64: 1>, scalar_prefetch = 0 : i64, scratch_operands = 0 : i64, tpu.core_type = #tpu.core_type<tc>, window_params = [{transform_indices = @transform_0, window_bounds = array<i64: 64, 32>}, {transform_indices = @transform_1, window_bounds = array<i64: 3, 8, 8>}, {pipeline_mode = #tpu.pipeline_mode<synchronous>, transform_indices = @transform_2, window_bounds = array<i64: 3, 8, 128>}, {pipeline_mode = #tpu.pipeline_mode<synchronous>, transform_indices = @transform_3, window_bounds = array<i64: 32, 128>}, {pipeline_mode = #tpu.pipeline_mode<synchronous>, transform_indices = @transform_4, window_bounds = array<i64: 1, 128>}, {pipeline_mode = #tpu.pipeline_mode<synchronous>, transform_indices = @transform_5, window_bounds = array<i64: 128, 128>}, {pipeline_mode = #tpu.pipeline_mode<synchronous>, transform_indices = @transform_6, window_bounds = array<i64: 1, 128>}, {transform_indices = @transform_7, window_bounds = array<i64: 8, 128>}]} {
    %c0 = arith.constant 0 : index
    %c0_0 = arith.constant 0 : index
    %0 = vector.load %arg1[%c0, %c0_0] : memref<64x32xf32, #tpu.memory_space<vmem>>, vector<64x32xf32>
    %c0_1 = arith.constant 0 : index
    %c0_2 = arith.constant 0 : index
    %1 = vector.load %arg4[%c0_1, %c0_2] : memref<32x128xf32, #tpu.memory_space<vmem>>, vector<32x128xf32>
    %cst = arith.constant dense<0.000000e+00> : vector<64x128xf32>
    %2 = tpu.matmul %0, %1, %cst {dimension_numbers = #tpu.dot_dimension_numbers<[1], [0], [0], [1], [0, 0, 1, 1], [], []>} : vector<64x32xf32>, vector<32x128xf32>, vector<64x128xf32> -> vector<64x128xf32>
    %c0_3 = arith.constant 0 : index
    %c0_4 = arith.constant 0 : index
    %3 = vector.load %arg5[%c0_3, %c0_4] : memref<1x128xf32, #tpu.memory_space<vmem>>, vector<1x128xf32>
    %4 = vector.broadcast %3 : vector<1x128xf32> to vector<64x128xf32>
    %5 = arith.addf %2, %4 : vector<64x128xf32>
    %cst_5 = arith.constant 0.000000e+00 : f32
    %6 = vector.broadcast %cst_5 : f32 to vector<64x128xf32>
    %7 = arith.maximumf %5, %6 : vector<64x128xf32>
    %c0_6 = arith.constant 0 : index
    %c0_7 = arith.constant 0 : index
    %8 = vector.load %arg6[%c0_6, %c0_7] : memref<128x128xf32, #tpu.memory_space<vmem>>, vector<128x128xf32>
    %cst_8 = arith.constant dense<0.000000e+00> : vector<64x128xf32>
    %9 = tpu.matmul %7, %8, %cst_8 {dimension_numbers = #tpu.dot_dimension_numbers<[1], [0], [0], [1], [0, 0, 1, 1], [], []>} : vector<64x128xf32>, vector<128x128xf32>, vector<64x128xf32> -> vector<64x128xf32>
    %c0_9 = arith.constant 0 : index
    %c0_10 = arith.constant 0 : index
    %10 = vector.load %arg7[%c0_9, %c0_10] : memref<1x128xf32, #tpu.memory_space<vmem>>, vector<1x128xf32>
    %11 = vector.broadcast %10 : vector<1x128xf32> to vector<64x128xf32>
    %12 = arith.addf %9, %11 : vector<64x128xf32>
    %13 = vector.shape_cast %12 : vector<64x128xf32> to vector<8x8x128xf32>
    %c0_11 = arith.constant 0 : index
    %c0_12 = arith.constant 0 : index
    %c0_13 = arith.constant 0 : index
    %14 = vector.load %arg2[%c0_11, %c0_12, %c0_13] : memref<3x8x8xf32, #tpu.memory_space<vmem>>, vector<1x8x8xf32>
    %15 = vector.shape_cast %14 : vector<1x8x8xf32> to vector<8x8xf32>
    %c1 = arith.constant 1 : index
    %c0_14 = arith.constant 0 : index
    %c0_15 = arith.constant 0 : index
    %16 = vector.load %arg2[%c1, %c0_14, %c0_15] : memref<3x8x8xf32, #tpu.memory_space<vmem>>, vector<1x8x8xf32>
    %17 = vector.shape_cast %16 : vector<1x8x8xf32> to vector<8x8xf32>
    %c2 = arith.constant 2 : index
    %c0_16 = arith.constant 0 : index
    %c0_17 = arith.constant 0 : index
    %18 = vector.load %arg2[%c2, %c0_16, %c0_17] : memref<3x8x8xf32, #tpu.memory_space<vmem>>, vector<1x8x8xf32>
    %19 = vector.shape_cast %18 : vector<1x8x8xf32> to vector<8x8xf32>
    %20 = arith.mulf %15, %15 : vector<8x8xf32>
    %21 = arith.mulf %17, %17 : vector<8x8xf32>
    %22 = arith.addf %20, %21 : vector<8x8xf32>
    %23 = arith.mulf %19, %19 : vector<8x8xf32>
    %24 = arith.addf %22, %23 : vector<8x8xf32>
    %25 = math.sqrt %24 : vector<8x8xf32>
    %cst_18 = arith.constant 9.99999993E-9 : f32
    %26 = vector.broadcast %cst_18 : f32 to vector<8x8xf32>
    %27 = arith.addf %25, %26 : vector<8x8xf32>
    %28 = tpu.reciprocal %27 : vector<8x8xf32> -> vector<8x8xf32>
    %cst_19 = arith.constant 9.99999993E-9 : f32
    %29 = vector.broadcast %cst_19 : f32 to vector<8x8xf32>
    %30 = arith.cmpf olt, %25, %29 : vector<8x8xf32>
    %cst_20 = arith.constant 0.000000e+00 : f32
    %31 = vector.broadcast %cst_20 : f32 to vector<8x8xf32>
    %32 = arith.select %30, %31, %28 : vector<8x8xi1>, vector<8x8xf32>
    %33 = arith.mulf %15, %32 : vector<8x8xf32>
    %34 = arith.mulf %17, %32 : vector<8x8xf32>
    %35 = arith.mulf %19, %32 : vector<8x8xf32>
    %c0_21 = arith.constant 0 : index
    %c0_22 = arith.constant 0 : index
    %c0_23 = arith.constant 0 : index
    %36 = vector.load %arg3[%c0_21, %c0_22, %c0_23] : memref<3x8x128xf32, #tpu.memory_space<vmem>>, vector<1x8x128xf32>
    %37 = vector.shape_cast %36 : vector<1x8x128xf32> to vector<8x128xf32>
    %c1_24 = arith.constant 1 : index
    %c0_25 = arith.constant 0 : index
    %c0_26 = arith.constant 0 : index
    %38 = vector.load %arg3[%c1_24, %c0_25, %c0_26] : memref<3x8x128xf32, #tpu.memory_space<vmem>>, vector<1x8x128xf32>
    %39 = vector.shape_cast %38 : vector<1x8x128xf32> to vector<8x128xf32>
    %c2_27 = arith.constant 2 : index
    %c0_28 = arith.constant 0 : index
    %c0_29 = arith.constant 0 : index
    %40 = vector.load %arg3[%c2_27, %c0_28, %c0_29] : memref<3x8x128xf32, #tpu.memory_space<vmem>>, vector<1x8x128xf32>
    %41 = vector.shape_cast %40 : vector<1x8x128xf32> to vector<8x128xf32>
    %42 = vector.shape_cast %33 : vector<8x8xf32> to vector<8x8x1xf32>
    %43 = vector.shape_cast %37 : vector<8x128xf32> to vector<1x8x128xf32>
    %44 = vector.broadcast %42 : vector<8x8x1xf32> to vector<8x8x128xf32>
    %45 = vector.broadcast %43 : vector<1x8x128xf32> to vector<8x8x128xf32>
    %46 = arith.mulf %44, %45 : vector<8x8x128xf32>
    %47 = vector.shape_cast %34 : vector<8x8xf32> to vector<8x8x1xf32>
    %48 = vector.shape_cast %39 : vector<8x128xf32> to vector<1x8x128xf32>
    %49 = vector.broadcast %47 : vector<8x8x1xf32> to vector<8x8x128xf32>
    %50 = vector.broadcast %48 : vector<1x8x128xf32> to vector<8x8x128xf32>
    %51 = arith.mulf %49, %50 : vector<8x8x128xf32>
    %52 = arith.addf %46, %51 : vector<8x8x128xf32>
    %53 = vector.shape_cast %35 : vector<8x8xf32> to vector<8x8x1xf32>
    %54 = vector.shape_cast %41 : vector<8x128xf32> to vector<1x8x128xf32>
    %55 = vector.broadcast %53 : vector<8x8x1xf32> to vector<8x8x128xf32>
    %56 = vector.broadcast %54 : vector<1x8x128xf32> to vector<8x8x128xf32>
    %57 = arith.mulf %55, %56 : vector<8x8x128xf32>
    %58 = arith.addf %52, %57 : vector<8x8x128xf32>
    %59 = arith.mulf %13, %58 : vector<8x8x128xf32>
    %cst_30 = arith.constant dense<0.000000e+00> : vector<8x128xf32>
    %60 = vector.multi_reduction <add>, %59, %cst_30 [1] : vector<8x8x128xf32> to vector<8x128xf32>
    %c0_31 = arith.constant 0 : index
    %c0_32 = arith.constant 0 : index
    %61 = vector.load %arg8[%c0_31, %c0_32] : memref<8x128xf32, #tpu.memory_space<vmem>>, vector<8x128xf32>
    tpu.vector_store %arg8[%c0_31, %c0_32], %60 {strides = array<i32>} : memref<8x128xf32, #tpu.memory_space<vmem>>, vector<8x128xf32>,
    return
  }
  func.func @transform_0(%arg0: i32) -> (i32, i32) {
    %c0_i32 = arith.constant 0 : i32
    %c0_i32_0 = arith.constant 0 : i32
    return %arg0, %c0_i32 : i32, i32
  }
  func.func @transform_1(%arg0: i32) -> (i32, i32, i32) {
    %c0_i32 = arith.constant 0 : i32
    %c0_i32_0 = arith.constant 0 : i32
    %c0_i32_1 = arith.constant 0 : i32
    return %c0_i32, %arg0, %c0_i32_0 : i32, i32, i32
  }
  func.func @transform_2(%arg0: i32) -> (i32, i32, i32) {
    %c0_i32 = arith.constant 0 : i32
    %c0_i32_0 = arith.constant 0 : i32
    %c0_i32_1 = arith.constant 0 : i32
    %c0_i32_2 = arith.constant 0 : i32
    return %c0_i32, %c0_i32_0, %c0_i32_1 : i32, i32, i32
  }
  func.func @transform_3(%arg0: i32) -> (i32, i32) {
    %c0_i32 = arith.constant 0 : i32
    %c0_i32_0 = arith.constant 0 : i32
    %c0_i32_1 = arith.constant 0 : i32
    return %c0_i32, %c0_i32_0 : i32, i32
  }
  func.func @transform_4(%arg0: i32) -> (i32, i32) {
    %c0_i32 = arith.constant 0 : i32
    %c0_i32_0 = arith.constant 0 : i32
    %c0_i32_1 = arith.constant 0 : i32
    return %c0_i32, %c0_i32_0 : i32, i32
  }
  func.func @transform_5(%arg0: i32) -> (i32, i32) {
    %c0_i32 = arith.constant 0 : i32
    %c0_i32_0 = arith.constant 0 : i32
    %c0_i32_1 = arith.constant 0 : i32
    return %c0_i32, %c0_i32_0 : i32, i32
  }
  func.func @transform_6(%arg0: i32) -> (i32, i32) {
    %c0_i32 = arith.constant 0 : i32
    %c0_i32_0 = arith.constant 0 : i32
    %c0_i32_1 = arith.constant 0 : i32
    return %c0_i32, %c0_i32_0 : i32, i32
  }
  func.func @transform_7(%arg0: i32) -> (i32, i32) {
    %c0_i32 = arith.constant 0 : i32
    %c0_i32_0 = arith.constant 0 : i32
    return %arg0, %c0_i32 : i32, i32
  }
}

</mosaic_0001>

<bundles_post_ra>
// kernel: tpu_custom_call.1
= control target key start
LH: loop header
LB: loop body
LE: loop exit
PB: predicated region body
PF: predicated region fallthrough
CT: control target
= control target key end

     0   :  { %12 = vsyncpa [#allocation3], 0  ;;  %s823_s0 = inlined_call_operand.vmem [shape: f32[64,32], index: 0, kind: input, shape index: {}]   ;;  %s824_s1 = inlined_call_operand.vmem [shape: f32[3,8,8], index: 1, kind: input, shape index: {}]   ;;  %s825_s2 = inlined_call_operand.vmem [shape: f32[3,8,128], index: 2, kind: input, shape index: {}]   ;;  %s826_s3 = inlined_call_operand.vmem [shape: f32[32,128], index: 3, kind: input, shape index: {}]   ;;  %s827_s4 = inlined_call_operand.vmem [shape: f32[1,128], index: 4, kind: input, shape index: {}]   ;;  %s828_s5 = inlined_call_operand.hbm [shape: f32[128,128], index: 5, kind: input, shape index: {}]   ;;  %s829_s6 = inlined_call_operand.vmem [shape: f32[1,128], index: 6, kind: input, shape index: {}]   ;;  %s830_s7 = inlined_call_operand.hbm [shape: f32[8,128], index: 7, kind: output, shape index: {}]  }
   0x1   :  { %13 = vsyncpa [#allocation4], 0  ;;  %s28_s26 = sshll.u32 %s828_s5, 4  ;;  %s659_s27 = smov [#allocation2]   ;;  %s29_s26 = int_to_ptr.hbm [resolvable:$true] %s28_s26 }
   0x2   :  { %s30_s28 = sshll.u32 %s659_s27, 4  ;;  %s660_s29 = smov 128   ;;  %s31_s28 = int_to_ptr.vmem [resolvable:$true] %s30_s28 }
   0x3   :  { %s661_s30 = smov 8  }
   0x4   :  { %36 = dma.hbm_to_vmem [thread:$0]  %s29_s26, 2048, %s31_s28, [#allocation3], %s660_s29, %s660_s29, %s661_s30  }
   0x5   :  { %655 = dma.done.wait [#allocation3], 2048  }
   0x6   :  { %656 = vsyncadd [#allocation3], 4294965248  ;;  %v54_v0 = vld [vmem:[%s826_s3 + $0x18] sm:$0xff]  ;;  %v53_v1 = vld [vmem:[%s826_s3 + $0x10] sm:$0xff]  ;;  %vm59_vm0 = vcmask 261120   ;;  %v242_v16 = vlaneseq  ;;  %vm513_vm8 = vcmask 1041409  }
   0x7   :  { %96 = vmatpush.msra.mxu0 %v54_v0  ;;  %558 = vmatpush.msra.mxu3 %v54_v0  ;;  %v52_v2 = vld [vmem:[%s826_s3 + $0x8] sm:$0xff]  ;;  %v51_v3 = vld [vmem:[%s826_s3] sm:$0xff]  ;;  %v731_v6 = vld [vmem:[%s824_s1 + $0x10] sm:$0xff]  ;;  %vm515_vm9 = vcmask 1042434   ;;  %vm517_vm10 = vcmask 1043459   ;;  %vm519_vm11 = vcmask 1044484  }
   0x8   :  { %v721_v4 = vld [vmem:[%s824_s1] sm:$0xff]  ;;  %v726_v5 = vld [vmem:[%s824_s1 + $0x8] sm:$0xff]  ;;  %v49_v9 = vld [vmem:[%s823_s0 + $0x30] sm:$0xff]  ;;  %v202_v11 = vmul.f32 %v731_v6, %v731_v6  ;;  %v243_v18 = vshrl.u32 %v242_v16, 7  ;;  %vm521_vm12 = vcmask 1045509   ;;  %vm523_vm13 = vcmask 1046534  }
   0x9   :  { %97 = vmatpush.msra.mxu0 %v53_v1  ;;  %559 = vmatpush.msra.mxu3 %v53_v1  ;;  %v199_v7 = vmul.f32 %v721_v4, %v721_v4  ;;  %v43_v8 = vld [vmem:[%s823_s0] sm:$0xff]  ;;  %v200_v10 = vmul.f32 %v726_v5, %v726_v5  ;;  %v44_v14 = vld [vmem:[%s823_s0 + $0x8] sm:$0xff]  ;;  %v50_v15 = vld [vmem:[%s823_s0 + $0x38] sm:$0xff]  ;;  %s536_s3 = sshll.u32 %s830_s7, 4  ;;  %vm525_vm14 = vcmask 1047559   ;;  %s537_s3 = int_to_ptr.hbm [resolvable:$true] %s536_s3 }
   0xa   :  { %598 = vset.pattern.permute.xlu0 %v243_v18  ;;  %599 = vset.pattern.permute.xlu1 %v243_v18  ;;  %v45_v21 = vld [vmem:[%s823_s0 + $0x10] sm:$0xff]  ;;  %v46_v27 = vld [vmem:[%s823_s0 + $0x18] sm:$0xff]  ;;  %v47_v31 = vld [vmem:[%s823_s0 + $0x20] sm:$0xff] }
   0xb   :  { %98 = vmatpush.msra.mxu0 %v52_v2  ;;  %560 = vmatpush.msra.mxu3 %v52_v2  ;;  %v201_v12 = vadd.f32 %v200_v10, %v199_v7  ;;  %v48_v37 = vld [vmem:[%s823_s0 + $0x28] sm:$0xff]  ;;  %v148_v41 = vld [vmem:[#allocation2 + $0x78] sm:$0xff]  ;;  %v147_v42 = vld [vmem:[#allocation2 + $0x70] sm:$0xff] }
   0xc   :  { %600 = vset.pattern.permute.xlu2 %v243_v18  ;;  %153 = vmatpush.msra.mxu1 %v148_v41  ;;  %v146_v45 = vld [vmem:[#allocation2 + $0x68] sm:$0xff]  ;;  %v145_v51 = vld [vmem:[#allocation2 + $0x60] sm:$0xff]  ;;  %v144_v52 = vld [vmem:[#allocation2 + $0x58] sm:$0xff] }
   0xd   :  { %99 = vmatpush.msra.mxu0 %v51_v3  ;;  %561 = vmatpush.msra.mxu3 %v51_v3  ;;  %v203_v13 = vadd.f32 %v202_v11, %v201_v12  ;;  %v143_v53 = vld [vmem:[#allocation2 + $0x50] sm:$0xff]  ;;  %v142_v56 = vld [vmem:[#allocation2 + $0x48] sm:$0xff]  ;;  %v141_v58 = vld [vmem:[#allocation2 + $0x40] sm:$0xff] }
   0xe   :  { %546 = vmatmul.msk.f32.vlgmr.msra.gmra.mxu0 %vm59_vm0, %v43_v8  ;;  %552 = vmatmul.msk.f32.vlgmr.msra.gmra.mxu3 %vm59_vm0, %v49_v9  ;;  %v140_v59 = vld [vmem:[#allocation2 + $0x38] sm:$0xff]  ;;  %v139_v60 = vld [vmem:[#allocation2 + $0x30] sm:$0xff]  ;;  %v138_v0 = vld [vmem:[#allocation2 + $0x28] sm:$0xff] }
   0xf   :  { %603 = vrsqrt.f32 %v203_v13  ;;  %vm211_vm1 = vcmp.eq.f32.partialorder %v203_v13, inf  ;;  %v214_v25 = vand.u32 2147483648, %v203_v13  ;;  %vm213_vm2 = vcmp.eq.f32.partialorder %v203_v13, 0.0  ;;  %563 = vmatpush.msrb.mxu3 %v148_v41  ;;  %562 = vmatpush.msra.mxu2 %v148_v41  ;;  %v137_v2 = vld [vmem:[#allocation2 + $0x20] sm:$0xff]  ;;  %v136_v3 = vld [vmem:[#allocation2 + $0x18] sm:$0xff]  ;;  %v134_v16 = vld [vmem:[#allocation2 + $0x8] sm:$0xff] }
  0x10   :  { %154 = vmatpush.msra.mxu1 %v147_v42 }
  0x11   :  { %565 = vmatpush.msrb.mxu3 %v147_v42  ;;  %564 = vmatpush.msra.mxu2 %v147_v42 }
  0x12   :  { %155 = vmatpush.msra.mxu1 %v146_v45 }
  0x13   :  { %567 = vmatpush.msrb.mxu3 %v146_v45  ;;  %566 = vmatpush.msra.mxu2 %v146_v45 }
  0x14   :  { %156 = vmatpush.msra.mxu1 %v145_v51 }
  0x15   :  { %v604_v17 = vpop.eup %603  ;;  %569 = vmatpush.msrb.mxu3 %v145_v51  ;;  %568 = vmatpush.msra.mxu2 %v145_v51 }
  0x16   :  { %547 = vmatmul.msk.f32.gmra.mxu0 %vm59_vm0, %v44_v14  ;;  %553 = vmatmul.msk.f32.gmra.mxu3 %vm59_vm0, %v50_v15  ;;  %v205_v19 = vmul.f32 %v604_v17, %v203_v13  ;;  %v135_v15 = vld [vmem:[#allocation2 + $0x10] sm:$0xff] }
  0x17   :  { %157 = vmatpush.msra.mxu1 %v144_v52  ;;  %571 = vmatpush.msrb.mxu3 %v144_v52 }
  0x18   :  { %v206_v20 = vmul.f32 %v604_v17, %v205_v19  ;;  %570 = vmatpush.msra.mxu2 %v144_v52 }
  0x19   :  { %158 = vmatpush.msra.mxu1 %v143_v53  ;;  %573 = vmatpush.msrb.mxu3 %v143_v53 }
  0x1a   :  { %v207_v22 = vmul.f32 0.5, %v206_v20  ;;  %572 = vmatpush.msra.mxu2 %v143_v53 }
  0x1b   :  { %159 = vmatpush.msra.mxu1 %v142_v56  ;;  %575 = vmatpush.msrb.mxu3 %v142_v56 }
  0x1c   :  { %v208_v23 = vsub.f32 1.5, %v207_v22  ;;  %574 = vmatpush.msra.mxu2 %v142_v56 }
  0x1d   :  { %160 = vmatpush.msra.mxu1 %v141_v58  ;;  %577 = vmatpush.msrb.mxu3 %v141_v58 }
  0x1e   :  { %548 = vmatmul.msk.f32.gmra.mxu0 %vm59_vm0, %v45_v21  ;;  %v209_v24 = vmul.f32 %v604_v17, %v208_v23  ;;  %576 = vmatpush.msra.mxu2 %v141_v58  ;;  %v133_v17 = vld [vmem:[#allocation2] sm:$0xff] }
  0x1f   :  { %161 = vmatpush.msra.mxu1 %v140_v59  ;;  %579 = vmatpush.msrb.mxu3 %v140_v59  ;;  %v601_v23 = vld [vmem:[%s827_s4] ss:$0 sm:$0xff] }
  0x20   :  { %v210_v26 = vmul.f32 %v209_v24, %v203_v13  ;;  %578 = vmatpush.msra.mxu2 %v140_v59 }
  0x21   :  { %162 = vmatpush.msra.mxu1 %v139_v60  ;;  %581 = vmatpush.msrb.mxu3 %v139_v60 }
  0x22   :  { %v212_v28 = vsel %vm211_vm1, %v203_v13, %v210_v26  ;;  %580 = vmatpush.msra.mxu2 %v139_v60 }
  0x23   :  { %v215_v29 = vsel %vm213_vm2, %v214_v25, %v212_v28  ;;  %163 = vmatpush.msra.mxu1 %v138_v0  ;;  %583 = vmatpush.msrb.mxu3 %v138_v0 }
  0x24   :  { %v216_v30 = vadd.f32 1e-08, %v215_v29  ;;  %vm231_vm7 = vcmp.lt.f32.partialorder %v215_v29, 1e-08  ;;  %582 = vmatpush.msra.mxu2 %v138_v0 }
  0x25   :  { %164 = vmatpush.msra.mxu1 %v137_v2  ;;  %585 = vmatpush.msrb.mxu3 %v137_v2 }
  0x26   :  { %549 = vmatmul.msk.f32.gmra.mxu0 %vm59_vm0, %v46_v27  ;;  %605 = vrcp.f32 %v216_v30  ;;  %v228_v34 = vand.u32 2147483648, %v216_v30  ;;  %vm222_vm3 = vweird.f32 %v216_v30  ;;  %v226_v36 = vand.u32 2147483647, %v216_v30  ;;  %584 = vmatpush.msra.mxu2 %v137_v2 }
  0x27   :  { %165 = vmatpush.msra.mxu1 %v136_v3  ;;  %587 = vmatpush.msrb.mxu3 %v136_v3 }
  0x28   :  { %v229_v39 = vor.u32 1.1754944e-38, %v228_v34  ;;  %vm227_vm6 = vcmp.eq.f32.partialorder %v226_v36, 8.507059e+37  ;;  %586 = vmatpush.msra.mxu2 %v136_v3 }
  0x29   :  { %166 = vmatpush.msra.mxu1 %v135_v15  ;;  %589 = vmatpush.msrb.mxu3 %v135_v15 }
  0x2a   :  { %588 = vmatpush.msra.mxu2 %v135_v15  ;;  %v795_v15 = vld [vmem:[%s825_s2 + $0x10] sm:$0xff] }
  0x2b   :  { %167 = vmatpush.msra.mxu1 %v134_v16  ;;  %591 = vmatpush.msrb.mxu3 %v134_v16 }
  0x2c   :  { %v606_v32 = vpop.eup %605  ;;  %590 = vmatpush.msra.mxu2 %v134_v16 }
  0x2d   :  { %v218_v33 = vmul.f32 %v606_v32, %v216_v30  ;;  %vm223_vm4 = vweird.f32 %v606_v32  ;;  %168 = vmatpush.msra.mxu1 %v133_v17  ;;  %593 = vmatpush.msrb.mxu3 %v133_v17 }
  0x2e   :  { %550 = vmatmul.msk.f32.gmra.mxu0 %vm59_vm0, %v47_v31  ;;  %vm224_vm5 = vmor %vm222_vm3, %vm223_vm4  ;;  %592 = vmatpush.msra.mxu2 %v133_v17 }
  0x2f   :  { %v219_v35 = vsub.f32 1.0, %v218_v33 }
  0x31   :  { %v220_v38 = vmul.f32 %v606_v32, %v219_v35 }
  0x33   :  { %v221_v40 = vadd.f32 %v606_v32, %v220_v38 }
  0x35   :  { %v225_v43 = vsel %vm224_vm5, %v606_v32, %v221_v40 }
  0x36   :  { %551 = vmatmul.msk.f32.gmra.mxu0 %vm59_vm0, %v48_v37  ;;  %v230_v44 = vsel %vm227_vm6, %v229_v39, %v225_v43 }
  0x37   :  { %v771_v46 = vsel %vm231_vm7, 0.0, %v230_v44 }
  0x38   :  { %v233_v47 = vmul.f32 %v771_v46, %v721_v4  ;;  %v234_v63 = vmul.f32 %v726_v5, %v771_v46  ;;  %v235_v10 = vmul.f32 %v731_v6, %v771_v46 }
  0x3a   :  { %v241_v48 = vperm.slane %v233_v47, 0  ;;  %v255_v49 = vperm.slane %v233_v47, 2  ;;  %v269_v50 = vperm.slane %v233_v47, 4  ;;  %v248_v54 = vperm.slane %v233_v47, 1 }
  0x3b   :  { %v262_v55 = vperm.slane %v233_v47, 3  ;;  %v276_v57 = vperm.slane %v233_v47, 5  ;;  %v283_v61 = vperm.slane %v233_v47, 6  ;;  %v290_v62 = vperm.slane %v233_v47, 7 }
  0x3c   :  { %246 = vperm.xlu0 %598, %v241_v48   ;;  %260 = vperm.xlu1 %599, %v255_v49   ;;  %v305_v1 = vperm.slane %v234_v63, 0  ;;  %v312_v4 = vperm.slane %v234_v63, 1  ;;  %v319_v5 = vperm.slane %v234_v63, 2  ;;  %v326_v7 = vperm.slane %v234_v63, 3 }
  0x3d   :  { %274 = vperm.xlu2 %600, %v269_v50   ;;  %v333_v8 = vperm.slane %v234_v63, 4  ;;  %v340_v9 = vperm.slane %v234_v63, 5  ;;  %v384_v11 = vperm.slane %v235_v10, 1  ;;  %v391_v12 = vperm.slane %v235_v10, 2 }
  0x3e   :  { %v347_v13 = vperm.slane %v234_v63, 6  ;;  %v405_v14 = vperm.slane %v235_v10, 4  ;;  %v377_v18 = vperm.slane %v235_v10, 0  ;;  %v412_v6 = vperm.slane %v235_v10, 5 }
  0x3f   :  { %v419_v19 = vperm.slane %v235_v10, 6  ;;  %v398_v20 = vperm.slane %v235_v10, 3  ;;  %v354_v21 = vperm.slane %v234_v63, 7  ;;  %v426_v22 = vperm.slane %v235_v10, 7 }
  0x44   :  { %253 = vperm.xlu0 %598, %v248_v54   ;;  %267 = vperm.xlu1 %599, %v262_v55  }
  0x45   :  { %281 = vperm.xlu2 %600, %v276_v57  }
  0x4c   :  { %288 = vperm.xlu0 %598, %v283_v61   ;;  %295 = vperm.xlu1 %599, %v290_v62  }
  0x4d   :  { %310 = vperm.xlu2 %600, %v305_v1  }
  0x54   :  { %317 = vperm.xlu0 %598, %v312_v4   ;;  %324 = vperm.xlu1 %599, %v319_v5   ;;  %v236_v4 = vld [vmem:[%s825_s2] sm:$0xff]  ;;  %v556_v5 = vld [vmem:[%s825_s2 + $0x8] sm:$0xff]  ;;  %s662_s2 = smov [#allocation5]  }
  0x55   :  { %331 = vperm.xlu2 %600, %v326_v7  }
  0x5c   :  { %338 = vperm.xlu0 %598, %v333_v8   ;;  %345 = vperm.xlu1 %599, %v340_v9  }
  0x5d   :  { %382 = vperm.xlu2 %600, %v377_v18  }
  0x64   :  { %389 = vperm.xlu0 %598, %v384_v11   ;;  %396 = vperm.xlu1 %599, %v391_v12  }
  0x65   :  { %403 = vperm.xlu2 %600, %v398_v20   ;;  %v801_v20 = vld [vmem:[%s829_s6] ss:$0 sm:$0xff]  ;;  %s534_s6 = sshll.u32 %s662_s2, 4  ;;  %s535_s6 = int_to_ptr.vmem [resolvable:$true] %s534_s6 }
  0x6c   :  { %352 = vperm.xlu0 %598, %v347_v13   ;;  %410 = vperm.xlu1 %599, %v405_v14  }
  0x6d   :  { %359 = vperm.xlu2 %600, %v354_v21  }
  0x74   :  { %417 = vperm.xlu0 %598, %v412_v6   ;;  %424 = vperm.xlu1 %599, %v419_v19  }
  0x75   :  { %431 = vperm.xlu2 %600, %v426_v22  }
  0x8b   :  { %v101_v24 = vpop.f32.mrf.mxu0 }
  0x8c   :  { %v102_v25 = vadd.f32 %v601_v23, %v101_v24 }
  0x8e   :  { %v125_v26 = vmax.f32 %v102_v25, 0.0 }
  0x90   :  { %169 = vmatmul.f32.vlgmr.msra.gmra.mxu1 %v125_v26 }
  0x91   :  { %v119_v27 = vpop.f32.mrf.mxu3 }
  0x92   :  { %v120_v28 = vadd.f32 %v601_v23, %v119_v27 }
  0x93   :  { %v104_v29 = vpop.f32.mrf.mxu0 }
  0x94   :  { %v131_v30 = vmax.f32 %v120_v28, 0.0  ;;  %v105_v31 = vadd.f32 %v601_v23, %v104_v29 }
  0x96   :  { %v126_v32 = vmax.f32 %v105_v31, 0.0  ;;  %187 = vmatmul.f32.vlgmr.msrb.gmra.mxu3 %v131_v30 }
  0x97   :  { %v275_v49 = vpop.permute.xlu2 %274 }
  0x98   :  { %172 = vmatmul.f32.gmra.mxu1 %v126_v32 }
  0x99   :  { %v122_v33 = vpop.f32.mrf.mxu3 }
  0x9a   :  { %v123_v34 = vadd.f32 %v601_v23, %v122_v33 }
  0x9b   :  { %v107_v35 = vpop.f32.mrf.mxu0 }
  0x9c   :  { %v132_v36 = vmax.f32 %v123_v34, 0.0  ;;  %v108_v37 = vadd.f32 %v601_v23, %v107_v35 }
  0x9e   :  { %v127_v38 = vmax.f32 %v108_v37, 0.0  ;;  %190 = vmatmul.f32.gmra.mxu3 %v132_v36 }
  0x9f   :  { %v782_v52 = vpop.permute.xlu2 %281 }
  0xa0   :  { %175 = vmatmul.f32.gmra.mxu1 %v127_v38  ;;  %v301_v38 = vmul.f32 %v275_v49, %v236_v4 }
  0xa3   :  { %v110_v39 = vpop.f32.mrf.mxu0 }
  0xa4   :  { %v111_v40 = vadd.f32 %v601_v23, %v110_v39 }
  0xa6   :  { %v128_v41 = vmax.f32 %v111_v40, 0.0 }
  0xa7   :  { %v311_v55 = vpop.permute.xlu2 %310 }
  0xa8   :  { %178 = vmatmul.f32.vlgmr.msra.gmra.mxu2 %v128_v41  ;;  %v361_v13 = vmul.f32 %v556_v5, %v311_v55 }
  0xab   :  { %v113_v42 = vpop.f32.mrf.mxu0 }
  0xac   :  { %v114_v43 = vadd.f32 %v601_v23, %v113_v42 }
  0xae   :  { %v129_v44 = vmax.f32 %v114_v43, 0.0  ;;  %v261_v48 = vpop.permute.xlu1 %260  ;;  %v247_v50 = vpop.permute.xlu0 %246 }
  0xaf   :  { %v332_v58 = vpop.permute.xlu2 %331  ;;  %v297_v11 = vmul.f32 %v247_v50, %v236_v4  ;;  %v299_v12 = vmul.f32 %v261_v48, %v236_v4 }
  0xb0   :  { %181 = vmatmul.f32.gmra.mxu2 %v129_v44  ;;  %v364_v18 = vmul.f32 %v556_v5, %v332_v58 }
  0xb1   :  { %v369_v22 = vadd.f32 %v361_v13, %v297_v11 }
  0xb3   :  { %v116_v45 = vpop.f32.mrf.mxu0 }
  0xb4   :  { %v117_v46 = vadd.f32 %v601_v23, %v116_v45 }
  0xb6   :  { %v130_v47 = vmax.f32 %v117_v46, 0.0  ;;  %v268_v51 = vpop.permute.xlu1 %267  ;;  %v254_v53 = vpop.permute.xlu0 %253 }
  0xb7   :  { %v383_v61 = vpop.permute.xlu2 %382  ;;  %v298_v9 = vmul.f32 %v254_v53, %v236_v4  ;;  %v300_v17 = vmul.f32 %v268_v51, %v236_v4 }
  0xb8   :  { %184 = vmatmul.f32.gmra.mxu2 %v130_v47  ;;  %v433_v24 = vmul.f32 %v795_v15, %v383_v61 }
  0xb9   :  { %v372_v26 = vadd.f32 %v364_v18, %v300_v17 }
  0xba   :  { %v441_v39 = vadd.f32 %v433_v24, %v369_v22 }
  0xbe   :  { %v296_v54 = vpop.permute.xlu1 %295  ;;  %v289_v56 = vpop.permute.xlu0 %288 }
  0xbf   :  { %v404_v1 = vpop.permute.xlu2 %403  ;;  %v303_v30 = vmul.f32 %v289_v56, %v236_v4  ;;  %v304_v33 = vmul.f32 %v296_v54, %v236_v4 }
  0xc0   :  { %v436_v27 = vmul.f32 %v795_v15, %v404_v1 }
  0xc2   :  { %v444_v44 = vadd.f32 %v436_v27, %v372_v26 }
  0xc6   :  { %v325_v57 = vpop.permute.xlu1 %324  ;;  %v318_v59 = vpop.permute.xlu0 %317 }
  0xc7   :  { %v360_v8 = vpop.permute.xlu2 %359  ;;  %v362_v10 = vmul.f32 %v556_v5, %v318_v59  ;;  %v363_v14 = vmul.f32 %v556_v5, %v325_v57 }
  0xc8   :  { %v368_v35 = vmul.f32 %v556_v5, %v360_v8 }
  0xc9   :  { %v370_v6 = vadd.f32 %v362_v10, %v298_v9  ;;  %v371_v23 = vadd.f32 %v363_v14, %v299_v12 }
  0xca   :  { %v376_v53 = vadd.f32 %v368_v35, %v304_v33 }
  0xce   :  { %v784_v60 = vpop.permute.xlu1 %345  ;;  %v339_v63 = vpop.permute.xlu0 %338 }
  0xcf   :  { %v432_v41 = vpop.permute.xlu2 %431  ;;  %v365_v43 = vmul.f32 %v556_v5, %v339_v63  ;;  %v366_v8 = vmul.f32 %v556_v5, %v784_v60 }
  0xd0   :  { %v440_v54 = vmul.f32 %v795_v15, %v432_v41 }
  0xd1   :  { %v373_v57 = vadd.f32 %v365_v43, %v301_v38 }
  0xd6   :  { %v397_v0 = vpop.permute.xlu1 %396  ;;  %v390_v3 = vpop.permute.xlu0 %389 }
  0xd7   :  { %v434_v19 = vmul.f32 %v795_v15, %v390_v3  ;;  %v435_v25 = vmul.f32 %v795_v15, %v397_v0  ;;  %v448_v0 = vadd.f32 %v440_v54, %v376_v53  ;;  %v302_v3 = vmul.f32 %v782_v52, %v236_v4 }
  0xd9   :  { %v442_v34 = vadd.f32 %v434_v19, %v370_v6  ;;  %v443_v40 = vadd.f32 %v435_v25, %v371_v23  ;;  %v374_v19 = vadd.f32 %v366_v8, %v302_v3 }
  0xde   :  { %v411_v7 = vpop.permute.xlu1 %410  ;;  %v353_v28 = vpop.permute.xlu0 %352 }
  0xdf   :  { %v367_v31 = vmul.f32 %v556_v5, %v353_v28  ;;  %v437_v58 = vmul.f32 %v795_v15, %v411_v7 }
  0xe1   :  { %v375_v47 = vadd.f32 %v367_v31, %v303_v30  ;;  %v445_v11 = vadd.f32 %v437_v58, %v373_v57 }
  0xe6   :  { %v425_v36 = vpop.permute.xlu1 %424  ;;  %v418_v12 = vpop.permute.xlu0 %417 }
  0xe7   :  { %v439_v48 = vmul.f32 %v795_v15, %v425_v36 }
 0x10d   :  { %v170_v62 = vpop.f32.mrf.mxu1 }
 0x10e   :  { %v171_v37 = vadd.f32 %v801_v20, %v170_v62  ;;  %v447_v62 = vadd.f32 %v439_v48, %v375_v47 }
 0x110   :  { %v449_v55 = vmul.f32 %v441_v39, %v171_v37 }
 0x112   :  { %v457_v1 = vrot.slane %v449_v55, 4 }
 0x114   :  { %v458_v17 = vadd.f32 %v457_v1, %v449_v55 }
 0x115   :  { %v173_v2 = vpop.f32.mrf.mxu1 }
 0x116   :  { %v174_v29 = vadd.f32 %v801_v20, %v173_v2  ;;  %v459_v5 = vrot.slane %v458_v17, 2 }
 0x118   :  { %v450_v45 = vmul.f32 %v442_v34, %v174_v29  ;;  %v460_v34 = vadd.f32 %v459_v5, %v458_v17 }
 0x119   :  { %v188_v16 = vpop.f32.mrf.mxu3 }
 0x11a   :  { %v189_v49 = vadd.f32 %v801_v20, %v188_v16  ;;  %v463_v59 = vrot.slane %v450_v45, 4 }
 0x11c   :  { %v455_v9 = vmul.f32 %v447_v62, %v189_v49  ;;  %v464_v13 = vadd.f32 %v463_v59, %v450_v45 }
 0x11d   :  { %v176_v21 = vpop.f32.mrf.mxu1 }
 0x11e   :  { %v177_v32 = vadd.f32 %v801_v20, %v176_v21  ;;  %v438_v21 = vmul.f32 %v795_v15, %v418_v12  ;;  %v493_v22 = vrot.slane %v455_v9, 4  ;;  %v465_v23 = vrot.slane %v464_v13, 2 }
 0x120   :  { %v451_v50 = vmul.f32 %v443_v40, %v177_v32  ;;  %v446_v26 = vadd.f32 %v438_v21, %v374_v19  ;;  %v494_v27 = vadd.f32 %v493_v22, %v455_v9  ;;  %v466_v29 = vadd.f32 %v465_v23, %v464_v13 }
 0x121   :  { %v191_v51 = vpop.f32.mrf.mxu3 }
 0x122   :  { %v192_v61 = vadd.f32 %v801_v20, %v191_v51  ;;  %v469_v63 = vrot.slane %v451_v50, 4  ;;  %v495_v36 = vrot.slane %v494_v27, 2  ;;  %v467_v38 = vrot.slane %v466_v29, 1 }
 0x124   :  { %v456_v14 = vmul.f32 %v448_v0, %v192_v61  ;;  %v470_v16 = vadd.f32 %v469_v63, %v451_v50  ;;  %v496_v45 = vadd.f32 %v495_v36, %v494_v27  ;;  %v468_v47 = vadd.f32 %v467_v38, %v466_v29 }
 0x126   :  { %v499_v52 = vrot.slane %v456_v14, 4  ;;  %v471_v60 = vrot.slane %v470_v16, 2  ;;  %v497_v55 = vrot.slane %v496_v45, 1 }
 0x128   :  { %v500_v30 = vadd.f32 %v499_v52, %v456_v14  ;;  %v472_v33 = vadd.f32 %v471_v60, %v470_v16  ;;  %v498_v63 = vadd.f32 %v497_v55, %v496_v45 }
 0x12a   :  { %v501_v39 = vrot.slane %v500_v30, 2  ;;  %v473_v41 = vrot.slane %v472_v33, 1 }
 0x12b   :  { %v179_v42 = vpop.f32.mrf.mxu2 }
 0x12c   :  { %v180_v46 = vadd.f32 %v801_v20, %v179_v42  ;;  %v461_v42 = vrot.slane %v460_v34, 1  ;;  %v502_v48 = vadd.f32 %v501_v39, %v500_v30 }
 0x12e   :  { %v452_v56 = vmul.f32 %v444_v44, %v180_v46  ;;  %v462_v51 = vadd.f32 %v461_v42, %v460_v34  ;;  %v503_v57 = vrot.slane %v502_v48, 1 }
 0x130   :  { %v475_v2 = vrot.slane %v452_v56, 4  ;;  %v514_v49 = vsel %vm513_vm8, %v468_v47, %v462_v51  ;;  %v504_v1 = vadd.f32 %v503_v57, %v502_v48 }
 0x132   :  { %v476_v18 = vadd.f32 %v475_v2, %v452_v56 }
 0x133   :  { %v182_v10 = vpop.f32.mrf.mxu2 }
 0x134   :  { %v183_v7 = vadd.f32 %v801_v20, %v182_v10  ;;  %v477_v24 = vrot.slane %v476_v18, 2 }
 0x136   :  { %v453_v6 = vmul.f32 %v445_v11, %v183_v7  ;;  %v478_v35 = vadd.f32 %v477_v24, %v476_v18 }
 0x138   :  { %v481_v4 = vrot.slane %v453_v6, 4  ;;  %v479_v43 = vrot.slane %v478_v35, 1 }
 0x13a   :  { %v482_v25 = vadd.f32 %v481_v4, %v453_v6  ;;  %v480_v53 = vadd.f32 %v479_v43, %v478_v35 }
 0x13b   :  { %v185_v28 = vpop.f32.mrf.mxu2 }
 0x13c   :  { %v483_v31 = vrot.slane %v482_v25, 2  ;;  %v186_v32 = vadd.f32 %v801_v20, %v185_v28  ;;  %v474_v20 = vadd.f32 %v473_v41, %v472_v33 }
 0x13e   :  { %v454_v15 = vmul.f32 %v446_v26, %v186_v32  ;;  %v484_v37 = vadd.f32 %v483_v31, %v482_v25  ;;  %v516_v59 = vsel %vm515_vm9, %v474_v20, %v514_v49 }
 0x13f   :  { %v518_v61 = vsel %vm517_vm10, %v480_v53, %v516_v59 }
 0x140   :  { %v487_v40 = vrot.slane %v454_v15, 4  ;;  %v485_v46 = vrot.slane %v484_v37, 1 }
 0x142   :  { %v488_v44 = vadd.f32 %v487_v40, %v454_v15  ;;  %v486_v56 = vadd.f32 %v485_v46, %v484_v37 }
 0x144   :  { %v489_v50 = vrot.slane %v488_v44, 2  ;;  %v520_v0 = vsel %vm519_vm11, %v486_v56, %v518_v61 }
 0x146   :  { %v490_v54 = vadd.f32 %v489_v50, %v488_v44 }
 0x148   :  { %v491_v58 = vrot.slane %v490_v54, 1 }
 0x14a   :  { %v492_v62 = vadd.f32 %v491_v58, %v490_v54 }
 0x14c   :  { %v522_v2 = vsel %vm521_vm12, %v492_v62, %v520_v0 }
 0x14d   :  { %v524_v3 = vsel %vm523_vm13, %v498_v63, %v522_v2 }
 0x14e   :  { %v526_v8 = vsel %vm525_vm14, %v504_v1, %v524_v3 }
 0x14f   :  { %528 = vst [vmem:[#allocation5] sm:$0xff] %v526_v8 }
 0x150   :  { %539 = dma.vmem_to_hbm [thread:$0]  %s535_s6, 128, %s537_s3, [#allocation4]  }
 0x151   :  { %657 = dma.done.wait [#allocation4], 128  }
 0x152   :  { %658 = vsyncadd [#allocation4], 4294967168 }
 0x153   :  { %544 = vsyncpa [#allocation3], 1 }
 0x154   :  { %545 = vsyncpa [#allocation4], 1 }

</bundles_post_ra>
